<compile_context>
chip_gen: v5e
topology: v5e:2x2
jax: 0.10.0
libtpu: 0.0.40
codegen_flags: <defaults>
</compile_context>

<pallas_src>
import jax
import jax.numpy as jnp
from jax.experimental import pallas as pl
from jax.experimental.pallas import tpu as pltpu

EPS = 1e-5   # nn.BatchNorm2d default eps
LANE = 128   # TPU lane width


def _round_up(x, m):
    return (x + m - 1) // m * m


# ---------------------------------------------------------------------------
# Pass A: tiled conv-as-matmul (bf16 operands, f32 accumulate) + per-channel
#         sum / sum-of-squares accumulated into grid-resident outputs.
# ---------------------------------------------------------------------------
def _conv_stats_kernel(p_ref, w_ref, h_ref, s1_ref, s2_ref):
    @pl.when(pl.program_id(0) == 0)
    def _init():
        s1_ref[...] = jnp.zeros_like(s1_ref)
        s2_ref[...] = jnp.zeros_like(s2_ref)

    h = jnp.dot(p_ref[...], w_ref[...], preferred_element_type=jnp.float32)
    h_ref[...] = h
    # one-pass BN statistics: s1 = sum(h), s2 = sum(h*h) per channel
    s1_ref[...] += jnp.sum(h, axis=0, keepdims=True)
    s2_ref[...] += jnp.sum(h * h, axis=0, keepdims=True)


def _conv_stats(patches, w, tm):
    m_pad, k = patches.shape
    cpad = w.shape[1]
    flops = 2 * m_pad * k * cpad
    bytes_accessed = (m_pad * k * 2 + k * cpad * 2      # bf16 inputs
                      + m_pad * cpad * 4 + 2 * cpad * 4)  # f32 outputs
    return pl.pallas_call(
        _conv_stats_kernel,
        grid=(m_pad // tm,),
        in_specs=[
            pl.BlockSpec((tm, k), lambda i: (i, 0)),
            pl.BlockSpec((k, cpad), lambda i: (0, 0)),
        ],
        out_specs=(
            pl.BlockSpec((tm, cpad), lambda i: (i, 0)),
            pl.BlockSpec((1, cpad), lambda i: (0, 0)),   # resident accumulator
            pl.BlockSpec((1, cpad), lambda i: (0, 0)),   # resident accumulator
        ),
        out_shape=(
            jax.ShapeDtypeStruct((m_pad, cpad), jnp.float32),
            jax.ShapeDtypeStruct((1, cpad), jnp.float32),
            jax.ShapeDtypeStruct((1, cpad), jnp.float32),
        ),
        compiler_params=pltpu.CompilerParams(
            dimension_semantics=("arbitrary",)),   # reduction over M tiles
        cost_estimate=pl.CostEstimate(
            flops=flops, transcendentals=0, bytes_accessed=bytes_accessed),
    )(patches, w)


# ---------------------------------------------------------------------------
# Pass B: elementwise BN (precomputed scale/shift) + ReLU (+ residual add)
# ---------------------------------------------------------------------------
def _bn_relu_kernel(h_ref, sc_ref, sh_ref, o_ref):
    o_ref[...] = jnp.maximum(h_ref[...] * sc_ref[...] + sh_ref[...], 0.0)


def _bn_add_relu_kernel(h_ref, sc_ref, sh_ref, id_ref, o_ref):
    o_ref[...] = jnp.maximum(
        h_ref[...] * sc_ref[...] + sh_ref[...] + id_ref[...], 0.0)


def _bn_relu(h, scale, shift, tm):
    m_pad, cpad = h.shape
    return pl.pallas_call(
        _bn_relu_kernel,
        grid=(m_pad // tm,),
        in_specs=[
            pl.BlockSpec((tm, cpad), lambda i: (i, 0)),
            pl.BlockSpec((1, cpad), lambda i: (0, 0)),
            pl.BlockSpec((1, cpad), lambda i: (0, 0)),
        ],
        out_specs=pl.BlockSpec((tm, cpad), lambda i: (i, 0)),
        out_shape=jax.ShapeDtypeStruct((m_pad, cpad), jnp.float32),
        compiler_params=pltpu.CompilerParams(
            dimension_semantics=("parallel",)),
    )(h, scale, shift)


def _bn_add_relu(h, scale, shift, identity, tm):
    m_pad, cpad = h.shape
    return pl.pallas_call(
        _bn_add_relu_kernel,
        grid=(m_pad // tm,),
        in_specs=[
            pl.BlockSpec((tm, cpad), lambda i: (i, 0)),
            pl.BlockSpec((1, cpad), lambda i: (0, 0)),
            pl.BlockSpec((1, cpad), lambda i: (0, 0)),
            pl.BlockSpec((tm, cpad), lambda i: (i, 0)),
        ],
        out_specs=pl.BlockSpec((tm, cpad), lambda i: (i, 0)),
        out_shape=jax.ShapeDtypeStruct((m_pad, cpad), jnp.float32),
        compiler_params=pltpu.CompilerParams(
            dimension_semantics=("parallel",)),
    )(h, scale, shift, identity)


# ---------------------------------------------------------------------------
# Glue (plain JAX): layout conversion, padding, patch extraction, BN algebra
# ---------------------------------------------------------------------------
def _im2col_3x3(x_nhwc):
    # TODO(synk): eliminate this HBM im2col expansion by gathering the 3x3 taps
    # in-kernel (accumulate 9 (tile_M,C)@(C,Cout) matmuls from the NHWC input).
    n, h, w, c = x_nhwc.shape
    xp = jnp.pad(x_nhwc, ((0, 0), (1, 1), (1, 1), (0, 0)))
    cols = [xp[:, dy:dy + h, dx:dx + w, :]
            for dy in range(3) for dx in range(3)]
    return jnp.concatenate(cols, axis=-1).reshape(n * h * w, 9 * c)


def _scale_shift(s1, s2, gamma_pad, beta_pad, m_true):
    mean = s1 / m_true
    var = jnp.maximum(s2 / m_true - mean * mean, 0.0)   # biased batch variance
    rstd = jax.lax.rsqrt(var + EPS)
    scale = gamma_pad * rstd
    shift = beta_pad - mean * scale
    return scale, shift


def basic_block_forward(x_nchw, w1_hwio, w2_hwio, g1, b1, g2, b2, *,
                        tile_m=256):
    """BasicBlock.forward with stride=1, downsample=None, inplanes==planes."""
    # TODO(synk): stride>1 / downsample branch not implemented (defaults unused).
    n, c, h, w = x_nchw.shape
    planes = w1_hwio.shape[-1]
    assert c == planes, "identity path requires inplanes == planes"

    m = n * h * w
    cpad = _round_up(max(planes, LANE), LANE)
    tm = max(8, (min(tile_m, _round_up(m, 8)) // 8) * 8)
    m_pad = _round_up(m, tm)

    x_nhwc = jnp.transpose(x_nchw, (0, 2, 3, 1)).astype(jnp.float32)

    def pack_w(w_hwio):
        k = 9 * w_hwio.shape[2]
        wm = w_hwio.reshape(k, planes).astype(jnp.float32)
        return jnp.pad(wm, ((0, 0), (0, cpad - planes))).astype(jnp.bfloat16)

    def pad_rows(a):
        return jnp.pad(a, ((0, m_pad - a.shape[0]), (0, 0)))

    def pad_vec(v, fill):
        return jnp.pad(v.reshape(1, -1).astype(jnp.float32),
                       ((0, 0), (0, cpad - planes)), constant_values=fill)

    w1m, w2m = pack_w(w1_hwio), pack_w(w2_hwio)
    g1p, b1p = pad_vec(g1, 1.0), pad_vec(b1, 0.0)
    g2p, b2p = pad_vec(g2, 1.0), pad_vec(b2, 0.0)

    # conv1 -> bn1(batch stats) -> relu
    p1 = pad_rows(_im2col_3x3(x_nhwc)).astype(jnp.bfloat16)
    h1, s11, s12 = _conv_stats(p1, w1m, tm)
    sc1, sh1 = _scale_shift(s11, s12, g1p, b1p, float(m))
    a1 = _bn_relu(h1, sc1, sh1, tm)                     # (m_pad, cpad) f32

    # conv2 -> bn2 -> += identity -> relu
    a1_img = a1[:m, :planes].reshape(n, h, w, planes)
    p2 = pad_rows(_im2col_3x3(a1_img)).astype(jnp.bfloat16)
    h2, s21, s22 = _conv_stats(p2, w2m, tm)
    sc2, sh2 = _scale_shift(s21, s22, g2p, b2p, float(m))
    identity = pad_rows(
        jnp.pad(x_nhwc.reshape(m, c), ((0, 0), (0, cpad - c))))
    out = _bn_add_relu(h2, sc2, sh2, identity, tm)

    out = out[:m, :planes].reshape(n, h, w, planes)
    return jnp.transpose(out, (0, 3, 1, 2))             # back to NCHW


# ---------------------------------------------------------------------------
# Pure-JAX reference (for correctness check)
# ---------------------------------------------------------------------------
def _ref_forward(x_nchw, w1, g1, b1, w2, g2, b2):
    def conv(x, w):
        return jax.lax.conv_general_dilated(
            x, w, window_strides=(1, 1), padding=((1, 1), (1, 1)),
            dimension_numbers=("NCHW", "HWIO", "NCHW"))

    def bn(x, g, b):
        mean = jnp.mean(x, axis=(0, 2, 3), keepdims=True)
        var = jnp.mean(jnp.square(x - mean), axis=(0, 2, 3), keepdims=True)
        return ((x - mean) * jax.lax.rsqrt(var + EPS)
                * g.reshape(1, -1, 1, 1) + b.reshape(1, -1, 1, 1))

    h = jnp.maximum(bn(conv(x_nchw, w1), g1, b1), 0.0)
    h2 = bn(conv(h, w2), g2, b2)
    return jnp.maximum(h2 + x_nchw, 0.0)


if __name__ == "__main__":
    key = jax.random.PRNGKey(0)
    N, C, H, W = 2, 4, 16, 16      # inplanes = planes = 4, stride = 1
    planes = 4

    k_x, k_w1, k_w2 = jax.random.split(key, 3)
    x = jax.random.normal(k_x, (N, C, H, W), jnp.float32)
    # conv weights stored directly in HWIO (synthetic deterministic init)
    w1 = jax.random.normal(k_w1, (3, 3, C, planes), jnp.float32) * (2.0 / (9 * C)) ** 0.5
    w2 = jax.random.normal(k_w2, (3, 3, planes, planes), jnp.float32) * (2.0 / (9 * planes)) ** 0.5
    # BatchNorm affine params: PyTorch default init (weight=1, bias=0)
    g1 = jnp.ones((planes,), jnp.float32)
    b1 = jnp.zeros((planes,), jnp.float32)
    g2 = jnp.ones((planes,), jnp.float32)
    b2 = jnp.zeros((planes,), jnp.float32)

    fwd = jax.jit(basic_block_forward)
    out = jax.block_until_ready(fwd(x, w1, w2, g1, b1, g2, b2))

    ref = _ref_forward(x, w1, g1, b1, w2, g2, b2)
    assert out.shape == (N, planes, H, W)
    # bf16 matmul operands loosen the tolerance vs the f32 reference.
    assert jnp.allclose(out, ref, atol=5e-2, rtol=5e-2), "mismatch vs reference"
    print("KERNEL_OK")
</pallas_src>

<mosaic_0001>
module attributes {stable_mosaic.version = 11 : i64} {
  func.func @_conv_stats_kernel(%arg0: i32, %arg1: memref<256x36xbf16, #tpu.memory_space<vmem>>, %arg2: memref<36x128xbf16, #tpu.memory_space<vmem>>, %arg3: memref<256x128xf32, #tpu.memory_space<vmem>>, %arg4: memref<1x128xf32, #tpu.memory_space<vmem>>, %arg5: memref<1x128xf32, #tpu.memory_space<vmem>>) attributes {dimension_semantics = [#tpu.dimension_semantics<arbitrary>], iteration_bounds = array<i64: 2>, scalar_prefetch = 0 : i64, scratch_operands = 0 : i64, tpu.core_type = #tpu.core_type<tc>, window_params = [{transform_indices = @transform_0, window_bounds = array<i64: 256, 36>}, {pipeline_mode = #tpu.pipeline_mode<synchronous>, transform_indices = @transform_1, window_bounds = array<i64: 36, 128>}, {transform_indices = @transform_2, window_bounds = array<i64: 256, 128>}, {pipeline_mode = #tpu.pipeline_mode<synchronous>, transform_indices = @transform_3, window_bounds = array<i64: 1, 128>}, {pipeline_mode = #tpu.pipeline_mode<synchronous>, transform_indices = @transform_4, window_bounds = array<i64: 1, 128>}]} {
    %c0_i32 = arith.constant 0 : i32
    %0 = arith.cmpi eq, %arg0, %c0_i32 : i32
    %1 = arith.extui %0 : i1 to i32
    %c0_i32_0 = arith.constant 0 : i32
    %2 = arith.cmpi ne, %1, %c0_i32_0 : i32
    scf.if %2 {
      %cst_16 = arith.constant 0.000000e+00 : f32
      %18 = vector.broadcast %cst_16 : f32 to vector<1x128xf32>
      %c0_17 = arith.constant 0 : index
      %c0_18 = arith.constant 0 : index
      %19 = vector.load %arg4[%c0_17, %c0_18] : memref<1x128xf32, #tpu.memory_space<vmem>>, vector<1x128xf32>
      tpu.vector_store %arg4[%c0_17, %c0_18], %18 {strides = array<i32>} : memref<1x128xf32, #tpu.memory_space<vmem>>, vector<1x128xf32>,
      %cst_19 = arith.constant 0.000000e+00 : f32
      %20 = vector.broadcast %cst_19 : f32 to vector<1x128xf32>
      %c0_20 = arith.constant 0 : index
      %c0_21 = arith.constant 0 : index
      %21 = vector.load %arg5[%c0_20, %c0_21] : memref<1x128xf32, #tpu.memory_space<vmem>>, vector<1x128xf32>
      tpu.vector_store %arg5[%c0_20, %c0_21], %20 {strides = array<i32>} : memref<1x128xf32, #tpu.memory_space<vmem>>, vector<1x128xf32>,
    } else {
    }
    %c0 = arith.constant 0 : index
    %c0_1 = arith.constant 0 : index
    %3 = vector.load %arg1[%c0, %c0_1] : memref<256x36xbf16, #tpu.memory_space<vmem>>, vector<256x36xbf16>
    %c0_2 = arith.constant 0 : index
    %c0_3 = arith.constant 0 : index
    %4 = vector.load %arg2[%c0_2, %c0_3] : memref<36x128xbf16, #tpu.memory_space<vmem>>, vector<36x128xbf16>
    %cst = arith.constant dense<0.000000e+00> : vector<256x128xf32>
    %5 = tpu.matmul %3, %4, %cst {dimension_numbers = #tpu.dot_dimension_numbers<[1], [0], [0], [1], [0, 0, 1, 1], [], []>} : vector<256x36xbf16>, vector<36x128xbf16>, vector<256x128xf32> -> vector<256x128xf32>
    %c0_4 = arith.constant 0 : index
    %c0_5 = arith.constant 0 : index
    %6 = vector.load %arg3[%c0_4, %c0_5] : memref<256x128xf32, #tpu.memory_space<vmem>>, vector<256x128xf32>
    tpu.vector_store %arg3[%c0_4, %c0_5], %5 {strides = array<i32>} : memref<256x128xf32, #tpu.memory_space<vmem>>, vector<256x128xf32>,
    %c0_6 = arith.constant 0 : index
    %c0_7 = arith.constant 0 : index
    %7 = vector.load %arg4[%c0_6, %c0_7] : memref<1x128xf32, #tpu.memory_space<vmem>>, vector<1x128xf32>
    %cst_8 = arith.constant dense<0.000000e+00> : vector<128xf32>
    %8 = vector.multi_reduction <add>, %5, %cst_8 [0] : vector<256x128xf32> to vector<128xf32>
    %9 = vector.shape_cast %8 : vector<128xf32> to vector<1x128xf32>
    %10 = arith.addf %7, %9 : vector<1x128xf32>
    %c0_9 = arith.constant 0 : index
    %c0_10 = arith.constant 0 : index
    %11 = vector.load %arg4[%c0_9, %c0_10] : memref<1x128xf32, #tpu.memory_space<vmem>>, vector<1x128xf32>
    tpu.vector_store %arg4[%c0_9, %c0_10], %10 {strides = array<i32>} : memref<1x128xf32, #tpu.memory_space<vmem>>, vector<1x128xf32>,
    %c0_11 = arith.constant 0 : index
    %c0_12 = arith.constant 0 : index
    %12 = vector.load %arg5[%c0_11, %c0_12] : memref<1x128xf32, #tpu.memory_space<vmem>>, vector<1x128xf32>
    %13 = arith.mulf %5, %5 : vector<256x128xf32>
    %cst_13 = arith.constant dense<0.000000e+00> : vector<128xf32>
    %14 = vector.multi_reduction <add>, %13, %cst_13 [0] : vector<256x128xf32> to vector<128xf32>
    %15 = vector.shape_cast %14 : vector<128xf32> to vector<1x128xf32>
    %16 = arith.addf %12, %15 : vector<1x128xf32>
    %c0_14 = arith.constant 0 : index
    %c0_15 = arith.constant 0 : index
    %17 = vector.load %arg5[%c0_14, %c0_15] : memref<1x128xf32, #tpu.memory_space<vmem>>, vector<1x128xf32>
    tpu.vector_store %arg5[%c0_14, %c0_15], %16 {strides = array<i32>} : memref<1x128xf32, #tpu.memory_space<vmem>>, vector<1x128xf32>,
    return
  }
  func.func @transform_0(%arg0: i32) -> (i32, i32) {
    %c0_i32 = arith.constant 0 : i32
    %c0_i32_0 = arith.constant 0 : i32
    return %arg0, %c0_i32 : i32, i32
  }
  func.func @transform_1(%arg0: i32) -> (i32, i32) {
    %c0_i32 = arith.constant 0 : i32
    %c0_i32_0 = arith.constant 0 : i32
    %c0_i32_1 = arith.constant 0 : i32
    return %c0_i32, %c0_i32_0 : i32, i32
  }
  func.func @transform_2(%arg0: i32) -> (i32, i32) {
    %c0_i32 = arith.constant 0 : i32
    %c0_i32_0 = arith.constant 0 : i32
    return %arg0, %c0_i32 : i32, i32
  }
  func.func @transform_3(%arg0: i32) -> (i32, i32) {
    %c0_i32 = arith.constant 0 : i32
    %c0_i32_0 = arith.constant 0 : i32
    %c0_i32_1 = arith.constant 0 : i32
    return %c0_i32, %c0_i32_0 : i32, i32
  }
  func.func @transform_4(%arg0: i32) -> (i32, i32) {
    %c0_i32 = arith.constant 0 : i32
    %c0_i32_0 = arith.constant 0 : i32
    %c0_i32_1 = arith.constant 0 : i32
    return %c0_i32, %c0_i32_0 : i32, i32
  }
}

module attributes {stable_mosaic.version = 11 : i64} {
  func.func @_bn_relu_kernel(%arg0: i32, %arg1: memref<256x128xf32, #tpu.memory_space<vmem>>, %arg2: memref<1x128xf32, #tpu.memory_space<vmem>>, %arg3: memref<1x128xf32, #tpu.memory_space<vmem>>, %arg4: memref<256x128xf32, #tpu.memory_space<vmem>>) attributes {dimension_semantics = [#tpu.dimension_semantics<parallel>], iteration_bounds = array<i64: 2>, scalar_prefetch = 0 : i64, scratch_operands = 0 : i64, tpu.core_type = #tpu.core_type<tc>, window_params = [{transform_indices = @transform_0, window_bounds = array<i64: 256, 128>}, {pipeline_mode = #tpu.pipeline_mode<synchronous>, transform_indices = @transform_1, window_bounds = array<i64: 1, 128>}, {pipeline_mode = #tpu.pipeline_mode<synchronous>, transform_indices = @transform_2, window_bounds = array<i64: 1, 128>}, {transform_indices = @transform_3, window_bounds = array<i64: 256, 128>}]} {
    %c0 = arith.constant 0 : index
    %c0_0 = arith.constant 0 : index
    %0 = vector.load %arg1[%c0, %c0_0] : memref<256x128xf32, #tpu.memory_space<vmem>>, vector<256x128xf32>
    %c0_1 = arith.constant 0 : index
    %c0_2 = arith.constant 0 : index
    %1 = vector.load %arg2[%c0_1, %c0_2] : memref<1x128xf32, #tpu.memory_space<vmem>>, vector<1x128xf32>
    %2 = vector.broadcast %1 : vector<1x128xf32> to vector<256x128xf32>
    %3 = arith.mulf %0, %2 : vector<256x128xf32>
    %c0_3 = arith.constant 0 : index
    %c0_4 = arith.constant 0 : index
    %4 = vector.load %arg3[%c0_3, %c0_4] : memref<1x128xf32, #tpu.memory_space<vmem>>, vector<1x128xf32>
    %5 = vector.broadcast %4 : vector<1x128xf32> to vector<256x128xf32>
    %6 = arith.addf %3, %5 : vector<256x128xf32>
    %cst = arith.constant 0.000000e+00 : f32
    %7 = vector.broadcast %cst : f32 to vector<256x128xf32>
    %8 = arith.maximumf %6, %7 : vector<256x128xf32>
    %c0_5 = arith.constant 0 : index
    %c0_6 = arith.constant 0 : index
    %9 = vector.load %arg4[%c0_5, %c0_6] : memref<256x128xf32, #tpu.memory_space<vmem>>, vector<256x128xf32>
    tpu.vector_store %arg4[%c0_5, %c0_6], %8 {strides = array<i32>} : memref<256x128xf32, #tpu.memory_space<vmem>>, vector<256x128xf32>,
    return
  }
  func.func @transform_0(%arg0: i32) -> (i32, i32) {
    %c0_i32 = arith.constant 0 : i32
    %c0_i32_0 = arith.constant 0 : i32
    return %arg0, %c0_i32 : i32, i32
  }
  func.func @transform_1(%arg0: i32) -> (i32, i32) {
    %c0_i32 = arith.constant 0 : i32
    %c0_i32_0 = arith.constant 0 : i32
    %c0_i32_1 = arith.constant 0 : i32
    return %c0_i32, %c0_i32_0 : i32, i32
  }
  func.func @transform_2(%arg0: i32) -> (i32, i32) {
    %c0_i32 = arith.constant 0 : i32
    %c0_i32_0 = arith.constant 0 : i32
    %c0_i32_1 = arith.constant 0 : i32
    return %c0_i32, %c0_i32_0 : i32, i32
  }
  func.func @transform_3(%arg0: i32) -> (i32, i32) {
    %c0_i32 = arith.constant 0 : i32
    %c0_i32_0 = arith.constant 0 : i32
    return %arg0, %c0_i32 : i32, i32
  }
}

module attributes {stable_mosaic.version = 11 : i64} {
  func.func @_bn_add_relu_kernel(%arg0: i32, %arg1: memref<256x128xf32, #tpu.memory_space<vmem>>, %arg2: memref<1x128xf32, #tpu.memory_space<vmem>>, %arg3: memref<1x128xf32, #tpu.memory_space<vmem>>, %arg4: memref<256x128xf32, #tpu.memory_space<vmem>>, %arg5: memref<256x128xf32, #tpu.memory_space<vmem>>) attributes {dimension_semantics = [#tpu.dimension_semantics<parallel>], iteration_bounds = array<i64: 2>, scalar_prefetch = 0 : i64, scratch_operands = 0 : i64, tpu.core_type = #tpu.core_type<tc>, window_params = [{transform_indices = @transform_0, window_bounds = array<i64: 256, 128>}, {pipeline_mode = #tpu.pipeline_mode<synchronous>, transform_indices = @transform_1, window_bounds = array<i64: 1, 128>}, {pipeline_mode = #tpu.pipeline_mode<synchronous>, transform_indices = @transform_2, window_bounds = array<i64: 1, 128>}, {transform_indices = @transform_3, window_bounds = array<i64: 256, 128>}, {transform_indices = @transform_4, window_bounds = array<i64: 256, 128>}]} {
    %c0 = arith.constant 0 : index
    %c0_0 = arith.constant 0 : index
    %0 = vector.load %arg1[%c0, %c0_0] : memref<256x128xf32, #tpu.memory_space<vmem>>, vector<256x128xf32>
    %c0_1 = arith.constant 0 : index
    %c0_2 = arith.constant 0 : index
    %1 = vector.load %arg2[%c0_1, %c0_2] : memref<1x128xf32, #tpu.memory_space<vmem>>, vector<1x128xf32>
    %2 = vector.broadcast %1 : vector<1x128xf32> to vector<256x128xf32>
    %3 = arith.mulf %0, %2 : vector<256x128xf32>
    %c0_3 = arith.constant 0 : index
    %c0_4 = arith.constant 0 : index
    %4 = vector.load %arg3[%c0_3, %c0_4] : memref<1x128xf32, #tpu.memory_space<vmem>>, vector<1x128xf32>
    %5 = vector.broadcast %4 : vector<1x128xf32> to vector<256x128xf32>
    %6 = arith.addf %3, %5 : vector<256x128xf32>
    %c0_5 = arith.constant 0 : index
    %c0_6 = arith.constant 0 : index
    %7 = vector.load %arg4[%c0_5, %c0_6] : memref<256x128xf32, #tpu.memory_space<vmem>>, vector<256x128xf32>
    %8 = arith.addf %6, %7 : vector<256x128xf32>
    %cst = arith.constant 0.000000e+00 : f32
    %9 = vector.broadcast %cst : f32 to vector<256x128xf32>
    %10 = arith.maximumf %8, %9 : vector<256x128xf32>
    %c0_7 = arith.constant 0 : index
    %c0_8 = arith.constant 0 : index
    %11 = vector.load %arg5[%c0_7, %c0_8] : memref<256x128xf32, #tpu.memory_space<vmem>>, vector<256x128xf32>
    tpu.vector_store %arg5[%c0_7, %c0_8], %10 {strides = array<i32>} : memref<256x128xf32, #tpu.memory_space<vmem>>, vector<256x128xf32>,
    return
  }
  func.func @transform_0(%arg0: i32) -> (i32, i32) {
    %c0_i32 = arith.constant 0 : i32
    %c0_i32_0 = arith.constant 0 : i32
    return %arg0, %c0_i32 : i32, i32
  }
  func.func @transform_1(%arg0: i32) -> (i32, i32) {
    %c0_i32 = arith.constant 0 : i32
    %c0_i32_0 = arith.constant 0 : i32
    %c0_i32_1 = arith.constant 0 : i32
    return %c0_i32, %c0_i32_0 : i32, i32
  }
  func.func @transform_2(%arg0: i32) -> (i32, i32) {
    %c0_i32 = arith.constant 0 : i32
    %c0_i32_0 = arith.constant 0 : i32
    %c0_i32_1 = arith.constant 0 : i32
    return %c0_i32, %c0_i32_0 : i32, i32
  }
  func.func @transform_3(%arg0: i32) -> (i32, i32) {
    %c0_i32 = arith.constant 0 : i32
    %c0_i32_0 = arith.constant 0 : i32
    return %arg0, %c0_i32 : i32, i32
  }
  func.func @transform_4(%arg0: i32) -> (i32, i32) {
    %c0_i32 = arith.constant 0 : i32
    %c0_i32_0 = arith.constant 0 : i32
    return %arg0, %c0_i32 : i32, i32
  }
}

</mosaic_0001>

<bundles_post_ra>
// kernel: basic_block_forward.5
= control target key start
LH: loop header
LB: loop body
LE: loop exit
PB: predicated region body
PF: predicated region fallthrough
CT: control target
= control target key end

     0   :  { %s447_s12 = smov 0   ;;  %s606_s0 = inlined_call_operand.vmem [shape: f32[512,128], index: 0, kind: input, shape index: {}]   ;;  %s607_s1 = inlined_call_operand.vmem [shape: f32[1,128], index: 1, kind: input, shape index: {}]   ;;  %s608_s2 = inlined_call_operand.vmem [shape: f32[1,128], index: 2, kind: input, shape index: {}]   ;;  %s609_s3 = inlined_call_operand.vmem [shape: f32[512,128], index: 3, kind: output, shape index: {}]  }
   0x1 LB: > { %s398_s13 = sadd.s32 4294967295, %s425_s12   ;;  %p402_p0 = scmp.ge.s32.totalorder %s425_s12, 1  ;;  %s425_s12 = sphi %s447_s12, %s13_s12  }
   0x2   : > { %p138_p1 = scmp.lt.s32.totalorder %s425_s12, 3 }
   0x4   : > { %p139_p2 = pnand %p402_p0, %p138_p1 }
   0x5   : > { %s403_s14 = sshll.u32 (!%p139_p2), %s398_s13, 5 }
   0x6   : > { %142 = sbr.rel (%p139_p2) target bundleno = 53 (0x35), region = 32  ;;  %p163_p3 = scmp.lt.s32.totalorder (!%p139_p2), %s403_s14, 63 }
   0xb   : > { %s611_s14 = smov (!%p163_p3, %s403_s14), 63  ;;  %v458_v0 = vld [vmem:[%s607_s1] ss:$0 sm:$0xff] }
   0xc   : > { %s404_s17 = sshll.u32 %s611_s14, 3  ;;  %v468_v1 = vld [vmem:[%s608_s2] ss:$0 sm:$0xff] }
   0xd   : > { %s463_s20 = scalar_lea.vmem %s606_s0, %s404_s17  ;;  %s491_s25 = scalar_lea.vmem %s609_s3, %s404_s17 }
   0xe   : > { %v174_v2 = vld [vmem:[%s463_s20] sm:$0xff]  ;;  %v175_v3 = vld [vmem:[%s463_s20 + $0x8] sm:$0xff]  ;;  %v176_v4 = vld [vmem:[%s463_s20 + $0x10] sm:$0xff] }
   0xf   : > { %v210_v5 = vmul.f32 %v458_v0, %v174_v2  ;;  %v211_v6 = vmul.f32 %v458_v0, %v175_v3  ;;  %v212_v7 = vmul.f32 %v458_v0, %v176_v4  ;;  %v177_v8 = vld [vmem:[%s463_s20 + $0x18] sm:$0xff]  ;;  %v178_v9 = vld [vmem:[%s463_s20 + $0x20] sm:$0xff]  ;;  %v179_v10 = vld [vmem:[%s463_s20 + $0x28] sm:$0xff] }
  0x10   : > { %v213_v11 = vmul.f32 %v458_v0, %v177_v8  ;;  %v214_v12 = vmul.f32 %v458_v0, %v178_v9  ;;  %v215_v13 = vmul.f32 %v458_v0, %v179_v10  ;;  %v180_v14 = vld [vmem:[%s463_s20 + $0x30] sm:$0xff]  ;;  %v181_v15 = vld [vmem:[%s463_s20 + $0x38] sm:$0xff]  ;;  %v182_v24 = vld [vmem:[%s463_s20 + $0x40] sm:$0xff] }
  0x11   : > { %v246_v16 = vadd.f32 %v468_v1, %v210_v5  ;;  %v247_v17 = vadd.f32 %v468_v1, %v211_v6  ;;  %v248_v18 = vadd.f32 %v468_v1, %v212_v7  ;;  %v216_v19 = vmul.f32 %v458_v0, %v180_v14  ;;  %v183_v25 = vld [vmem:[%s463_s20 + $0x48] sm:$0xff]  ;;  %v184_v26 = vld [vmem:[%s463_s20 + $0x50] sm:$0xff]  ;;  %v185_v31 = vld [vmem:[%s463_s20 + $0x58] sm:$0xff] }
  0x12   : > { %v249_v20 = vadd.f32 %v468_v1, %v213_v11  ;;  %v250_v21 = vadd.f32 %v468_v1, %v214_v12  ;;  %v251_v22 = vadd.f32 %v468_v1, %v215_v13  ;;  %v217_v23 = vmul.f32 %v458_v0, %v181_v15  ;;  %v186_v32 = vld [vmem:[%s463_s20 + $0x60] sm:$0xff]  ;;  %v187_v33 = vld [vmem:[%s463_s20 + $0x68] sm:$0xff]  ;;  %v188_v37 = vld [vmem:[%s463_s20 + $0x70] sm:$0xff] }
  0x13   : > { %v278_v27 = vmax.f32 %v246_v16, 0.0  ;;  %v279_v28 = vmax.f32 %v247_v17, 0.0  ;;  %v280_v29 = vmax.f32 %v248_v18, 0.0  ;;  %v252_v30 = vadd.f32 %v468_v1, %v216_v19  ;;  %v189_v42 = vld [vmem:[%s463_s20 + $0x78] sm:$0xff]  ;;  %v190_v54 = vld [vmem:[%s463_s20 + $0x80] sm:$0xff]  ;;  %v191_v55 = vld [vmem:[%s463_s20 + $0x88] sm:$0xff] }
  0x14   : > { %v281_v34 = vmax.f32 %v249_v20, 0.0  ;;  %v282_v35 = vmax.f32 %v250_v21, 0.0  ;;  %v253_v36 = vadd.f32 %v468_v1, %v217_v23  ;;  %v283_v38 = vmax.f32 %v251_v22, 0.0  ;;  %v192_v56 = vld [vmem:[%s463_s20 + $0x90] sm:$0xff]  ;;  %v193_v59 = vld [vmem:[%s463_s20 + $0x98] sm:$0xff]  ;;  %v194_v63 = vld [vmem:[%s463_s20 + $0xa0] sm:$0xff] }
  0x15   : > { %310 = vst [vmem:[%s491_s25] sm:$0xff] %v278_v27  ;;  %v218_v39 = vmul.f32 %v458_v0, %v182_v24  ;;  %v219_v40 = vmul.f32 %v458_v0, %v183_v25  ;;  %v220_v41 = vmul.f32 %v458_v0, %v184_v26  ;;  %v284_v43 = vmax.f32 %v252_v30, 0.0  ;;  %v195_v6 = vld [vmem:[%s463_s20 + $0xa8] sm:$0xff]  ;;  %v196_v10 = vld [vmem:[%s463_s20 + $0xb0] sm:$0xff]  ;;  %v197_v14 = vld [vmem:[%s463_s20 + $0xb8] sm:$0xff] }
  0x16   : > { %311 = vst [vmem:[%s491_s25 + $0x8] sm:$0xff] %v279_v28  ;;  %v221_v44 = vmul.f32 %v458_v0, %v185_v31  ;;  %v222_v45 = vmul.f32 %v458_v0, %v186_v32  ;;  %v223_v46 = vmul.f32 %v458_v0, %v187_v33  ;;  %v224_v50 = vmul.f32 %v458_v0, %v188_v37  ;;  %v198_v18 = vld [vmem:[%s463_s20 + $0xc0] sm:$0xff]  ;;  %v199_v22 = vld [vmem:[%s463_s20 + $0xc8] sm:$0xff]  ;;  %v200_v26 = vld [vmem:[%s463_s20 + $0xd0] sm:$0xff] }
  0x17   : > { %312 = vst [vmem:[%s491_s25 + $0x10] sm:$0xff] %v280_v29  ;;  %v254_v47 = vadd.f32 %v468_v1, %v218_v39  ;;  %v255_v48 = vadd.f32 %v468_v1, %v219_v40  ;;  %v256_v49 = vadd.f32 %v468_v1, %v220_v41  ;;  %v285_v51 = vmax.f32 %v253_v36, 0.0  ;;  %v201_v30 = vld [vmem:[%s463_s20 + $0xd8] sm:$0xff] }
  0x18   : > { %313 = vst [vmem:[%s491_s25 + $0x18] sm:$0xff] %v281_v34  ;;  %v257_v52 = vadd.f32 %v468_v1, %v221_v44  ;;  %v225_v53 = vmul.f32 %v458_v0, %v189_v42  ;;  %v258_v58 = vadd.f32 %v468_v1, %v222_v45  ;;  %v259_v62 = vadd.f32 %v468_v1, %v223_v46  ;;  %v202_v34 = vld [vmem:[%s463_s20 + $0xe0] sm:$0xff]  ;;  %v204_v42 = vld [vmem:[%s463_s20 + $0xf0] sm:$0xff]  ;;  %v205_v46 = vld [vmem:[%s463_s20 + $0xf8] sm:$0xff] }
  0x19   : > { %314 = vst [vmem:[%s491_s25 + $0x20] sm:$0xff] %v282_v35  ;;  %v286_v57 = vmax.f32 %v254_v47, 0.0  ;;  %v287_v60 = vmax.f32 %v255_v48, 0.0  ;;  %v288_v61 = vmax.f32 %v256_v49, 0.0  ;;  %v260_v2 = vadd.f32 %v468_v1, %v224_v50 }
  0x1a   : > { %315 = vst [vmem:[%s491_s25 + $0x28] sm:$0xff] %v283_v38  ;;  %v226_v3 = vmul.f32 %v458_v0, %v190_v54  ;;  %v227_v4 = vmul.f32 %v458_v0, %v191_v55  ;;  %v228_v5 = vmul.f32 %v458_v0, %v192_v56  ;;  %v289_v7 = vmax.f32 %v257_v52, 0.0  ;;  %v203_v38 = vld [vmem:[%s463_s20 + $0xe8] sm:$0xff] }
  0x1b   : > { %316 = vst [vmem:[%s491_s25 + $0x30] sm:$0xff] %v284_v43  ;;  %v261_v8 = vadd.f32 %v468_v1, %v225_v53  ;;  %v229_v9 = vmul.f32 %v458_v0, %v193_v59  ;;  %v290_v11 = vmax.f32 %v258_v58, 0.0  ;;  %v230_v13 = vmul.f32 %v458_v0, %v194_v63 }
  0x1c   : > { %317 = vst [vmem:[%s491_s25 + $0x38] sm:$0xff] %v285_v51  ;;  %v262_v12 = vadd.f32 %v468_v1, %v226_v3  ;;  %v291_v15 = vmax.f32 %v259_v62, 0.0  ;;  %v263_v16 = vadd.f32 %v468_v1, %v227_v4  ;;  %v231_v17 = vmul.f32 %v458_v0, %v195_v6 }
  0x1d   : > { %318 = vst [vmem:[%s491_s25 + $0x40] sm:$0xff] %v286_v57  ;;  %v292_v19 = vmax.f32 %v260_v2, 0.0  ;;  %v264_v20 = vadd.f32 %v468_v1, %v228_v5  ;;  %v232_v21 = vmul.f32 %v458_v0, %v196_v10  ;;  %v293_v23 = vmax.f32 %v261_v8, 0.0 }
  0x1e   : > { %319 = vst [vmem:[%s491_s25 + $0x48] sm:$0xff] %v287_v60  ;;  %v265_v24 = vadd.f32 %v468_v1, %v229_v9  ;;  %v233_v25 = vmul.f32 %v458_v0, %v197_v14  ;;  %v294_v27 = vmax.f32 %v262_v12, 0.0  ;;  %v266_v28 = vadd.f32 %v468_v1, %v230_v13 }
  0x1f   : > { %320 = vst [vmem:[%s491_s25 + $0x50] sm:$0xff] %v288_v61  ;;  %v234_v29 = vmul.f32 %v458_v0, %v198_v18  ;;  %v295_v31 = vmax.f32 %v263_v16, 0.0  ;;  %v267_v32 = vadd.f32 %v468_v1, %v231_v17  ;;  %v235_v33 = vmul.f32 %v458_v0, %v199_v22 }
  0x20   : > { %321 = vst [vmem:[%s491_s25 + $0x58] sm:$0xff] %v289_v7  ;;  %v296_v35 = vmax.f32 %v264_v20, 0.0  ;;  %v268_v36 = vadd.f32 %v468_v1, %v232_v21  ;;  %v236_v37 = vmul.f32 %v458_v0, %v200_v26  ;;  %v297_v39 = vmax.f32 %v265_v24, 0.0 }
  0x21   : > { %322 = vst [vmem:[%s491_s25 + $0x60] sm:$0xff] %v290_v11  ;;  %v269_v40 = vadd.f32 %v468_v1, %v233_v25  ;;  %v237_v41 = vmul.f32 %v458_v0, %v201_v30  ;;  %v298_v43 = vmax.f32 %v266_v28, 0.0  ;;  %v270_v44 = vadd.f32 %v468_v1, %v234_v29 }
  0x22   : > { %323 = vst [vmem:[%s491_s25 + $0x68] sm:$0xff] %v291_v15  ;;  %v238_v45 = vmul.f32 %v458_v0, %v202_v34  ;;  %v299_v47 = vmax.f32 %v267_v32, 0.0  ;;  %v271_v48 = vadd.f32 %v468_v1, %v235_v33  ;;  %v239_v49 = vmul.f32 %v458_v0, %v203_v38 }
  0x23   : > { %324 = vst [vmem:[%s491_s25 + $0x70] sm:$0xff] %v292_v19  ;;  %v300_v50 = vmax.f32 %v268_v36, 0.0  ;;  %v272_v51 = vadd.f32 %v468_v1, %v236_v37  ;;  %v240_v52 = vmul.f32 %v458_v0, %v204_v42  ;;  %v301_v53 = vmax.f32 %v269_v40, 0.0 }
  0x24   : > { %325 = vst [vmem:[%s491_s25 + $0x78] sm:$0xff] %v293_v23  ;;  %v273_v54 = vadd.f32 %v468_v1, %v237_v41  ;;  %v241_v55 = vmul.f32 %v458_v0, %v205_v46  ;;  %v302_v56 = vmax.f32 %v270_v44, 0.0  ;;  %v274_v57 = vadd.f32 %v468_v1, %v238_v45 }
  0x25   : > { %326 = vst [vmem:[%s491_s25 + $0x80] sm:$0xff] %v294_v27  ;;  %v303_v58 = vmax.f32 %v271_v48, 0.0  ;;  %v275_v59 = vadd.f32 %v468_v1, %v239_v49  ;;  %v304_v60 = vmax.f32 %v272_v51, 0.0  ;;  %v276_v61 = vadd.f32 %v468_v1, %v240_v52 }
  0x26   : > { %327 = vst [vmem:[%s491_s25 + $0x88] sm:$0xff] %v295_v31  ;;  %v305_v0 = vmax.f32 %v273_v54, 0.0  ;;  %v277_v62 = vadd.f32 %v468_v1, %v241_v55  ;;  %v306_v63 = vmax.f32 %v274_v57, 0.0 }
  0x27   : > { %328 = vst [vmem:[%s491_s25 + $0x90] sm:$0xff] %v296_v35  ;;  %v307_v2 = vmax.f32 %v275_v59, 0.0  ;;  %v308_v3 = vmax.f32 %v276_v61, 0.0 }
  0x28   : > { %329 = vst [vmem:[%s491_s25 + $0x98] sm:$0xff] %v297_v39  ;;  %v309_v4 = vmax.f32 %v277_v62, 0.0 }
  0x29   : > { %330 = vst [vmem:[%s491_s25 + $0xa0] sm:$0xff] %v298_v43 }
  0x2a   : > { %331 = vst [vmem:[%s491_s25 + $0xa8] sm:$0xff] %v299_v47 }
  0x2b   : > { %332 = vst [vmem:[%s491_s25 + $0xb0] sm:$0xff] %v300_v50 }
  0x2c   : > { %333 = vst [vmem:[%s491_s25 + $0xb8] sm:$0xff] %v301_v53 }
  0x2d   : > { %334 = vst [vmem:[%s491_s25 + $0xc0] sm:$0xff] %v302_v56 }
  0x2e   : > { %335 = vst [vmem:[%s491_s25 + $0xc8] sm:$0xff] %v303_v58 }
  0x2f   : > { %336 = vst [vmem:[%s491_s25 + $0xd0] sm:$0xff] %v304_v60 }
  0x30   : > { %337 = vst [vmem:[%s491_s25 + $0xd8] sm:$0xff] %v305_v0 }
  0x31   : > { %338 = vst [vmem:[%s491_s25 + $0xe0] sm:$0xff] %v306_v63 }
  0x32   : > { %339 = vst [vmem:[%s491_s25 + $0xe8] sm:$0xff] %v307_v2 }
  0x33   : > { %340 = vst [vmem:[%s491_s25 + $0xf0] sm:$0xff] %v308_v3 }
  0x34   : > { %341 = vst [vmem:[%s491_s25 + $0xf8] sm:$0xff] %v309_v4 }
  0x35 PF: > { %s13_s12 = sadd.s32 1, %s425_s12  }
  0x36   : > { %p10_p4 = scmp.ge.s32.totalorder %s13_s12, 4  }
  0x38   :  { %12 = sbr.rel (!%p10_p4) target bundleno = 1 (0x1), region = 62 }

// kernel: basic_block_forward.4
= control target key start
LH: loop header
LB: loop body
LE: loop exit
PB: predicated region body
PF: predicated region fallthrough
CT: control target
= control target key end

     0   :  { %s859_s15 = smov 0   ;;  %s1085_s0 = inlined_call_operand.vmem [shape: bf16[512,36], index: 0, kind: input, shape index: {}]   ;;  %s1086_s1 = inlined_call_operand.vmem [shape: bf16[36,128], index: 1, kind: input, shape index: {}]   ;;  %s1087_s2 = inlined_call_operand.vmem [shape: f32[512,128], index: 2, kind: output, shape index: {0}]   ;;  %s1088_s3 = inlined_call_operand.vmem [shape: f32[1,128], index: 3, kind: output, shape index: {1}]   ;;  %s1089_s4 = inlined_call_operand.vmem [shape: f32[1,128], index: 4, kind: output, shape index: {2}]  }
   0x1 LB: > { %s689_s16 = sadd.s32 4294967295, %s831_s15   ;;  %p693_p0 = scmp.ge.s32.totalorder %s831_s15, 1  ;;  %s831_s15 = sphi %s859_s15, %s15_s15  }
   0x2   : > { %p158_p1 = scmp.lt.s32.totalorder %s831_s15, 3 }
   0x4   : > { %p159_p2 = pnand %p693_p0, %p158_p1 }
   0x5   : > { %s694_s17 = sshll.u32 (!%p159_p2), %s689_s16, 5  ;;  %p698_p4 = scmp.ne.s32.totalorder (!%p159_p2), %s689_s16, 0 }
   0x6   : > { %162 = sbr.rel (%p159_p2) target bundleno = 285 (0x11d), region = 28  ;;  %p185_p3 = scmp.lt.s32.totalorder (!%p159_p2), %s694_s17, 63 }
   0xb   : > { %s1091_s17 = smov (!%p185_p3, %s694_s17), 63  ;;  %200 = sbr.rel (%p698_p4) target bundleno = 19 (0x13), region = 32 }
   0xc   : > { %s695_s18 = sshll.u32 %s1091_s17, 2  ;;  %s697_s19 = sshll.u32 %s1091_s17, 3 }
   0xd   : > { %s870_s22 = scalar_lea.vmem %s1085_s0, %s695_s18  ;;  %s875_s25 = scalar_lea.vmem %s1087_s2, %s697_s19 }
  0x10   : > { %v833_v0 = vmov 0.0  }
  0x11   : > { %201 = vst [vmem:[%s1088_s3] sm:$0x1] %v833_v0 }
  0x12   : > { %202 = vst [vmem:[%s1089_s4] sm:$0x1] %v833_v0 }
  0x13 PF: > { %v239_v1 = vld [vmem:[%s1086_s1 + $0x10] sm:$0x3]  ;;  %vm384_vm0 = vcmask 1041408   ;;  %v806_v5 = vld [vmem:[%s1086_s1 + $0x8] sm:$0xff]  ;;  %v805_v6 = vld [vmem:[%s1086_s1] sm:$0xff]  ;;  %vm335_vm1 = vcmask 293888  }
  0x14   : > { %v329_v2 = vunpack.c.l.b16 %v239_v1  ;;  %v789_v7 = vld [vmem:[%s870_s22] sm:$0xff]  ;;  %v790_v11 = vld [vmem:[%s870_s22 + $0x8] sm:$0xff]  ;;  %v791_v15 = vld [vmem:[%s870_s22 + $0x10] sm:$0xff] }
  0x15   : > { %v793_v8 = vld [vmem:[%s870_s22 + $0x20] sm:$0xff]  ;;  %v794_v12 = vld [vmem:[%s870_s22 + $0x28] sm:$0xff]  ;;  %v795_v16 = vld [vmem:[%s870_s22 + $0x30] sm:$0xff] }
  0x16   : > { %v332_v3 = vpack.c.b16 %v329_v2, %v329_v2  ;;  %v797_v9 = vld [vmem:[%s870_s22 + $0x40] sm:$0xff]  ;;  %v798_v13 = vld [vmem:[%s870_s22 + $0x48] sm:$0xff]  ;;  %v799_v17 = vld [vmem:[%s870_s22 + $0x50] sm:$0xff] }
  0x17   : > { %v801_v10 = vld [vmem:[%s870_s22 + $0x60] sm:$0xff]  ;;  %v802_v14 = vld [vmem:[%s870_s22 + $0x68] sm:$0xff]  ;;  %v803_v18 = vld [vmem:[%s870_s22 + $0x70] sm:$0xff] }
  0x18   : > { %v386_v4 = vsel %vm384_vm0, %v332_v3, 0  ;;  %v792_v19 = vld [vmem:[%s870_s22 + $0x18] sm:$0xff] }
  0x19   : > { %393 = vmatpush.bf16.msra.mxu0 %v386_v4  ;;  %807 = vmatpush.bf16.msra.mxu1 %v386_v4  ;;  %v796_v20 = vld [vmem:[%s870_s22 + $0x38] sm:$0xff] }
  0x1a   : > { %808 = vmatpush.bf16.msra.mxu2 %v386_v4  ;;  %809 = vmatpush.bf16.msra.mxu3 %v386_v4  ;;  %v800_v21 = vld [vmem:[%s870_s22 + $0x58] sm:$0xff] }
  0x1b   : > { %v804_v22 = vld [vmem:[%s870_s22 + $0x78] sm:$0xff] }
  0x1d   : > { %394 = vmatpush.bf16.msra.mxu0 %v806_v5  ;;  %810 = vmatpush.bf16.msra.mxu1 %v806_v5 }
  0x1e   : > { %811 = vmatpush.bf16.msra.mxu2 %v806_v5  ;;  %812 = vmatpush.bf16.msra.mxu3 %v806_v5 }
  0x21   : > { %395 = vmatpush.bf16.msra.mxu0 %v805_v6  ;;  %813 = vmatpush.bf16.msra.mxu1 %v805_v6 }
  0x22   : > { %814 = vmatpush.bf16.msra.mxu2 %v805_v6  ;;  %815 = vmatpush.bf16.msra.mxu3 %v805_v6 }
  0x24   : > { %771 = vmatmul.msk.bf16.vlgmr.msra.gmra.mxu0 %vm335_vm1, %v789_v7  ;;  %775 = vmatmul.msk.bf16.vlgmr.msra.gmra.mxu1 %vm335_vm1, %v793_v8 }
  0x25   : > { %779 = vmatmul.msk.bf16.vlgmr.msra.gmra.mxu2 %vm335_vm1, %v797_v9  ;;  %783 = vmatmul.msk.bf16.vlgmr.msra.gmra.mxu3 %vm335_vm1, %v801_v10 }
  0x34   : > { %772 = vmatmul.msk.bf16.gmra.mxu0 %vm335_vm1, %v790_v11  ;;  %776 = vmatmul.msk.bf16.gmra.mxu1 %vm335_vm1, %v794_v12 }
  0x35   : > { %780 = vmatmul.msk.bf16.gmra.mxu2 %vm335_vm1, %v798_v13  ;;  %784 = vmatmul.msk.bf16.gmra.mxu3 %vm335_vm1, %v802_v14 }
  0x44   : > { %773 = vmatmul.msk.bf16.gmra.mxu0 %vm335_vm1, %v791_v15  ;;  %777 = vmatmul.msk.bf16.gmra.mxu1 %vm335_vm1, %v795_v16 }
  0x45   : > { %781 = vmatmul.msk.bf16.gmra.mxu2 %vm335_vm1, %v799_v17  ;;  %785 = vmatmul.msk.bf16.gmra.mxu3 %vm335_vm1, %v803_v18 }
  0x54   : > { %774 = vmatmul.msk.bf16.gmra.mxu0 %vm335_vm1, %v792_v19  ;;  %778 = vmatmul.msk.bf16.gmra.mxu1 %vm335_vm1, %v796_v20 }
  0x55   : > { %782 = vmatmul.msk.bf16.gmra.mxu2 %vm335_vm1, %v800_v21  ;;  %786 = vmatmul.msk.bf16.gmra.mxu3 %vm335_vm1, %v804_v22 }
  0xa1   : > { %v397_v23 = vpop.f32.mrf.mxu0  ;;  %v924_v24 = vpop.f32.mrf.mxu1 }
  0xa2   : > { %477 = vst [vmem:[%s875_s25] sm:$0xff] %v397_v23  ;;  %v550_v46 = vmul.f32 %v397_v23, %v397_v23  ;;  %v558_v10 = vmul.f32 %v924_v24, %v924_v24 }
  0xa3   : > { %485 = vst [vmem:[%s875_s25 + $0x40] sm:$0xff] %v924_v24 }
  0xa8   : > { %v929_v25 = vpop.f32.mrf.mxu2  ;;  %v936_v28 = vpop.f32.mrf.mxu3 }
  0xa9   : > { %v399_v26 = vpop.f32.mrf.mxu0  ;;  %v931_v27 = vpop.f32.mrf.mxu1  ;;  %493 = vst [vmem:[%s875_s25 + $0x80] sm:$0xff] %v929_v25 }
  0xaa   : > { %478 = vst [vmem:[%s875_s25 + $0x8] sm:$0xff] %v399_v26  ;;  %v551_v45 = vmul.f32 %v399_v26, %v399_v26  ;;  %v510_v47 = vadd.f32 %v399_v26, %v397_v23  ;;  %v559_v13 = vmul.f32 %v931_v27, %v931_v27 }
  0xab   : > { %486 = vst [vmem:[%s875_s25 + $0x48] sm:$0xff] %v931_v27 }
  0xac   : > { %501 = vst [vmem:[%s875_s25 + $0xc0] sm:$0xff] %v936_v28  ;;  %v582_v49 = vadd.f32 %v551_v45, %v550_v46 }
  0xb0   : > { %v942_v29 = vpop.f32.mrf.mxu2  ;;  %v949_v32 = vpop.f32.mrf.mxu3 }
  0xb1   : > { %v402_v30 = vpop.f32.mrf.mxu0  ;;  %v944_v31 = vpop.f32.mrf.mxu1  ;;  %494 = vst [vmem:[%s875_s25 + $0x88] sm:$0xff] %v942_v29 }
  0xb2   : > { %479 = vst [vmem:[%s875_s25 + $0x10] sm:$0xff] %v402_v30  ;;  %v552_v48 = vmul.f32 %v402_v30, %v402_v30  ;;  %v511_v50 = vadd.f32 %v510_v47, %v402_v30  ;;  %v560_v16 = vmul.f32 %v944_v31, %v944_v31 }
  0xb3   : > { %487 = vst [vmem:[%s875_s25 + $0x50] sm:$0xff] %v944_v31 }
  0xb4   : > { %502 = vst [vmem:[%s875_s25 + $0xc8] sm:$0xff] %v949_v32  ;;  %v583_v55 = vadd.f32 %v582_v49, %v552_v48  ;;  %v566_v48 = vmul.f32 %v929_v25, %v929_v25 }
  0xb8   : > { %v955_v33 = vpop.f32.mrf.mxu2  ;;  %v962_v36 = vpop.f32.mrf.mxu3 }
  0xb9   : > { %v404_v34 = vpop.f32.mrf.mxu0  ;;  %v957_v35 = vpop.f32.mrf.mxu1  ;;  %495 = vst [vmem:[%s875_s25 + $0x90] sm:$0xff] %v955_v33 }
  0xba   : > { %480 = vst [vmem:[%s875_s25 + $0x18] sm:$0xff] %v404_v34  ;;  %v553_v51 = vmul.f32 %v404_v34, %v404_v34  ;;  %v512_v56 = vadd.f32 %v511_v50, %v404_v34  ;;  %v561_v20 = vmul.f32 %v957_v35, %v957_v35 }
  0xbb   : > { %488 = vst [vmem:[%s875_s25 + $0x58] sm:$0xff] %v957_v35 }
  0xbc   : > { %503 = vst [vmem:[%s875_s25 + $0xd0] sm:$0xff] %v962_v36  ;;  %v584_v59 = vadd.f32 %v583_v55, %v553_v51 }
  0xc0   : > { %v968_v37 = vpop.f32.mrf.mxu2  ;;  %v975_v40 = vpop.f32.mrf.mxu3 }
  0xc1   : > { %v407_v38 = vpop.f32.mrf.mxu0  ;;  %v970_v39 = vpop.f32.mrf.mxu1  ;;  %496 = vst [vmem:[%s875_s25 + $0x98] sm:$0xff] %v968_v37 }
  0xc2   : > { %481 = vst [vmem:[%s875_s25 + $0x20] sm:$0xff] %v407_v38  ;;  %v554_v57 = vmul.f32 %v407_v38, %v407_v38  ;;  %v513_v60 = vadd.f32 %v512_v56, %v407_v38  ;;  %v569_v56 = vmul.f32 %v968_v37, %v968_v37 }
  0xc3   : > { %489 = vst [vmem:[%s875_s25 + $0x60] sm:$0xff] %v970_v39 }
  0xc4   : > { %504 = vst [vmem:[%s875_s25 + $0xd8] sm:$0xff] %v975_v40  ;;  %v585_v62 = vadd.f32 %v584_v59, %v554_v57 }
  0xc8   : > { %v981_v41 = vpop.f32.mrf.mxu2  ;;  %v988_v44 = vpop.f32.mrf.mxu3 }
  0xc9   : > { %v409_v42 = vpop.f32.mrf.mxu0  ;;  %v983_v43 = vpop.f32.mrf.mxu1  ;;  %497 = vst [vmem:[%s875_s25 + $0xa0] sm:$0xff] %v981_v41 }
  0xca   : > { %482 = vst [vmem:[%s875_s25 + $0x28] sm:$0xff] %v409_v42  ;;  %v555_v61 = vmul.f32 %v409_v42, %v409_v42  ;;  %v514_v63 = vadd.f32 %v513_v60, %v409_v42  ;;  %v563_v30 = vmul.f32 %v983_v43, %v983_v43 }
  0xcb   : > { %490 = vst [vmem:[%s875_s25 + $0x68] sm:$0xff] %v983_v43 }
  0xcc   : > { %505 = vst [vmem:[%s875_s25 + $0xe0] sm:$0xff] %v988_v44  ;;  %v586_v1 = vadd.f32 %v585_v62, %v555_v61 }
  0xd0   : > { %v994_v52 = vpop.f32.mrf.mxu2  ;;  %v999_v58 = vpop.f32.mrf.mxu3 }
  0xd1   : > { %v412_v53 = vpop.f32.mrf.mxu0  ;;  %v432_v54 = vpop.f32.mrf.mxu1  ;;  %498 = vst [vmem:[%s875_s25 + $0xa8] sm:$0xff] %v994_v52  ;;  %v571_v62 = vmul.f32 %v994_v52, %v994_v52 }
  0xd2   : > { %483 = vst [vmem:[%s875_s25 + $0x30] sm:$0xff] %v412_v53  ;;  %v556_v0 = vmul.f32 %v412_v53, %v412_v53  ;;  %v515_v2 = vadd.f32 %v514_v63, %v412_v53  ;;  %v564_v42 = vmul.f32 %v432_v54, %v432_v54 }
  0xd3   : > { %491 = vst [vmem:[%s875_s25 + $0x70] sm:$0xff] %v432_v54 }
  0xd4   : > { %506 = vst [vmem:[%s875_s25 + $0xe8] sm:$0xff] %v999_v58  ;;  %v587_v6 = vadd.f32 %v586_v1, %v556_v0 }
  0xd8   : > { %v452_v3 = vpop.f32.mrf.mxu2  ;;  %v1006_v9 = vpop.f32.mrf.mxu3 }
  0xd9   : > { %v414_v4 = vpop.f32.mrf.mxu0  ;;  %v434_v5 = vpop.f32.mrf.mxu1  ;;  %499 = vst [vmem:[%s875_s25 + $0xb0] sm:$0xff] %v452_v3  ;;  %v572_v1 = vmul.f32 %v452_v3, %v452_v3 }
  0xda   : > { %484 = vst [vmem:[%s875_s25 + $0x38] sm:$0xff] %v414_v4  ;;  %v516_v7 = vadd.f32 %v515_v2, %v414_v4  ;;  %v557_v8 = vmul.f32 %v414_v4, %v414_v4 }
  0xdb   : > { %492 = vst [vmem:[%s875_s25 + $0x78] sm:$0xff] %v434_v5 }
  0xdc   : > { %v517_v11 = vadd.f32 %v516_v7, %v924_v24  ;;  %v588_v12 = vadd.f32 %v587_v6, %v557_v8  ;;  %507 = vst [vmem:[%s875_s25 + $0xf0] sm:$0xff] %v1006_v9  ;;  %v562_v24 = vmul.f32 %v970_v39, %v970_v39 }
  0xde   : > { %v518_v14 = vadd.f32 %v517_v11, %v931_v27  ;;  %v589_v15 = vadd.f32 %v588_v12, %v558_v10  ;;  %v577_v12 = vmul.f32 %v975_v40, %v975_v40 }
  0xe0   : > { %v519_v17 = vadd.f32 %v518_v14, %v944_v31  ;;  %v590_v18 = vadd.f32 %v589_v15, %v559_v13  ;;  %v454_v19 = vpop.f32.mrf.mxu2  ;;  %v474_v23 = vpop.f32.mrf.mxu3 }
  0xe1   : > { %500 = vst [vmem:[%s875_s25 + $0xb8] sm:$0xff] %v454_v19 }
  0xe2   : > { %v591_v21 = vadd.f32 %v590_v18, %v560_v16  ;;  %v520_v22 = vadd.f32 %v519_v17, %v957_v35  ;;  %508 = vst [vmem:[%s875_s25 + $0xf8] sm:$0xff] %v474_v23  ;;  %v565_v35 = vmul.f32 %v434_v5, %v434_v5  ;;  %v579_v17 = vmul.f32 %v999_v58, %v999_v58 }
  0xe4   : > { %v521_v26 = vadd.f32 %v520_v22, %v970_v39  ;;  %v592_v27 = vadd.f32 %v591_v21, %v561_v20  ;;  %v567_v39 = vmul.f32 %v942_v29, %v942_v29  ;;  %v580_v20 = vmul.f32 %v1006_v9, %v1006_v9 }
  0xe5   : > { %v581_v22 = vmul.f32 %v474_v23, %v474_v23 }
  0xe6   : > { %v522_v31 = vadd.f32 %v521_v26, %v983_v43  ;;  %v593_v34 = vadd.f32 %v592_v27, %v562_v24  ;;  %v568_v43 = vmul.f32 %v955_v33, %v955_v33 }
  0xe8   : > { %v523_v38 = vadd.f32 %v522_v31, %v432_v54  ;;  %v594_v45 = vadd.f32 %v593_v34, %v563_v30 }
  0xea   : > { %v595_v46 = vadd.f32 %v594_v45, %v564_v42  ;;  %v524_v47 = vadd.f32 %v523_v38, %v434_v5  ;;  %v573_v5 = vmul.f32 %v454_v19, %v454_v19  ;;  %v509_v45 = vld [vmem:[%s1088_s3] sm:$0x1] }
  0xec   : > { %v525_v49 = vadd.f32 %v524_v47, %v929_v25  ;;  %v596_v50 = vadd.f32 %v595_v46, %v565_v35  ;;  %v570_v25 = vmul.f32 %v981_v41, %v981_v41 }
  0xee   : > { %v526_v51 = vadd.f32 %v525_v49, %v942_v29  ;;  %v597_v53 = vadd.f32 %v596_v50, %v566_v48 }
  0xf0   : > { %v527_v54 = vadd.f32 %v526_v51, %v955_v33  ;;  %v598_v55 = vadd.f32 %v597_v53, %v567_v39 }
  0xf2   : > { %v599_v57 = vadd.f32 %v598_v55, %v568_v43  ;;  %v528_v59 = vadd.f32 %v527_v54, %v968_v37  ;;  %v574_v37 = vmul.f32 %v936_v28, %v936_v28 }
  0xf4   : > { %v529_v60 = vadd.f32 %v528_v59, %v981_v41  ;;  %v600_v61 = vadd.f32 %v599_v57, %v569_v56  ;;  %v575_v41 = vmul.f32 %v949_v32, %v949_v32 }
  0xf6   : > { %v530_v29 = vadd.f32 %v529_v60, %v994_v52  ;;  %v601_v63 = vadd.f32 %v600_v61, %v570_v25  ;;  %v576_v52 = vmul.f32 %v962_v36, %v962_v36 }
  0xf8   : > { %v602_v33 = vadd.f32 %v601_v63, %v571_v62  ;;  %v531_v0 = vadd.f32 %v530_v29, %v452_v3 }
  0xfa   : > { %v603_v2 = vadd.f32 %v602_v33, %v572_v1  ;;  %v532_v4 = vadd.f32 %v531_v0, %v454_v19 }
  0xfc   : > { %v533_v6 = vadd.f32 %v532_v4, %v936_v28  ;;  %v604_v7 = vadd.f32 %v603_v2, %v573_v5  ;;  %v578_v28 = vmul.f32 %v988_v44, %v988_v44 }
  0xfe   : > { %v534_v8 = vadd.f32 %v533_v6, %v949_v32  ;;  %v605_v10 = vadd.f32 %v604_v7, %v574_v37 }
 0x100   : > { %v535_v3 = vadd.f32 %v534_v8, %v962_v36  ;;  %v606_v11 = vadd.f32 %v605_v10, %v575_v41 }
 0x102   : > { %v607_v13 = vadd.f32 %v606_v11, %v576_v52  ;;  %v536_v14 = vadd.f32 %v535_v3, %v975_v40 }
 0x104   : > { %v537_v15 = vadd.f32 %v536_v14, %v988_v44  ;;  %v608_v16 = vadd.f32 %v607_v13, %v577_v12 }
 0x106   : > { %v538_v32 = vadd.f32 %v537_v15, %v999_v58  ;;  %v609_v18 = vadd.f32 %v608_v16, %v578_v28 }
 0x108   : > { %v610_v36 = vadd.f32 %v609_v18, %v579_v17  ;;  %v539_v19 = vadd.f32 %v538_v32, %v1006_v9  ;;  %v549_v9 = vld [vmem:[%s1089_s4] sm:$0x1] }
 0x10a   : > { %v611_v21 = vadd.f32 %v610_v36, %v580_v20  ;;  %v540_v40 = vadd.f32 %v539_v19, %v474_v23 }
 0x10c   : > { %v541_v24 = vrot.slane %v540_v40, 4  ;;  %v612_v26 = vadd.f32 %v611_v21, %v581_v22 }
 0x10e   : > { %v542_v27 = vadd.f32 %v541_v24, %v540_v40  ;;  %v613_v44 = vrot.slane %v612_v26, 4 }
 0x110   : > { %v543_v30 = vrot.slane %v542_v27, 2  ;;  %v614_v31 = vadd.f32 %v613_v44, %v612_v26 }
 0x112   : > { %v544_v34 = vadd.f32 %v543_v30, %v542_v27  ;;  %v615_v38 = vrot.slane %v614_v31, 2 }
 0x114   : > { %v545_v42 = vrot.slane %v544_v34, 1  ;;  %v616_v58 = vadd.f32 %v615_v38, %v614_v31 }
 0x116   : > { %v546_v46 = vadd.f32 %v545_v42, %v544_v34  ;;  %v617_v47 = vrot.slane %v616_v58, 1 }
 0x118   : > { %v547_v23 = vadd.f32 %v546_v46, %v509_v45  ;;  %v618_v35 = vadd.f32 %v617_v47, %v616_v58 }
 0x11a   : > { %548 = vst [vmem:[%s1088_s3] sm:$0x1] %v547_v23  ;;  %v619_v48 = vadd.f32 %v618_v35, %v549_v9 }
 0x11c   : > { %620 = vst [vmem:[%s1089_s4] sm:$0x1] %v619_v48 }
 0x11d PF: > { %s15_s15 = sadd.s32 1, %s831_s15  }
 0x11e   : > { %p12_p5 = scmp.ge.s32.totalorder %s15_s15, 4  }
 0x120   :  { %14 = sbr.rel (!%p12_p5) target bundleno = 1 (0x1), region = 78 }

// kernel: basic_block_forward.7
= control target key start
LH: loop header
LB: loop body
LE: loop exit
PB: predicated region body
PF: predicated region fallthrough
CT: control target
= control target key end

     0   :  { %s579_s15 = smov 0   ;;  %s780_s0 = inlined_call_operand.vmem [shape: f32[512,128], index: 0, kind: input, shape index: {}]   ;;  %s781_s1 = inlined_call_operand.vmem [shape: f32[1,128], index: 1, kind: input, shape index: {}]   ;;  %s782_s2 = inlined_call_operand.vmem [shape: f32[1,128], index: 2, kind: input, shape index: {}]   ;;  %s783_s3 = inlined_call_operand.vmem [shape: f32[512,128], index: 3, kind: input, shape index: {}]   ;;  %s784_s4 = inlined_call_operand.vmem [shape: f32[512,128], index: 4, kind: output, shape index: {}]  }
   0x1 LB: > { %s523_s16 = sadd.s32 4294967295, %s552_s15   ;;  %p527_p0 = scmp.ge.s32.totalorder %s552_s15, 1  ;;  %s552_s15 = sphi %s579_s15, %s14_s15  }
   0x2   : > { %p174_p1 = scmp.lt.s32.totalorder %s552_s15, 3 }
   0x4   : > { %p175_p2 = pnand %p527_p0, %p174_p1 }
   0x5   : > { %s528_s17 = sshll.u32 (!%p175_p2), %s523_s16, 5 }
   0x6   : > { %178 = sbr.rel (%p175_p2) target bundleno = 55 (0x37), region = 36  ;;  %p206_p3 = scmp.lt.s32.totalorder (!%p175_p2), %s528_s17, 63 }
   0xb   : > { %s786_s17 = smov (!%p206_p3, %s528_s17), 63  ;;  %v590_v0 = vld [vmem:[%s781_s1] ss:$0 sm:$0xff] }
   0xc   : > { %s592_s20 = sshll.u32 %s786_s17, 3  ;;  %v609_v1 = vld [vmem:[%s782_s2] ss:$0 sm:$0xff] }
   0xd   : > { %s598_s23 = scalar_lea.vmem %s780_s0, %s592_s20  ;;  %s604_s26 = scalar_lea.vmem %s783_s3, %s592_s20 }
   0xe   : > { %v223_v2 = vld [vmem:[%s598_s23] sm:$0xff]  ;;  %v224_v3 = vld [vmem:[%s598_s23 + $0x8] sm:$0xff]  ;;  %v225_v7 = vld [vmem:[%s598_s23 + $0x10] sm:$0xff]  ;;  %s640_s5 = scalar_lea.vmem %s784_s4, %s592_s20 }
   0xf   : > { %v259_v4 = vmul.f32 %v590_v0, %v223_v2  ;;  %v327_v5 = vld [vmem:[%s604_s26] sm:$0xff]  ;;  %v260_v6 = vmul.f32 %v590_v0, %v224_v3  ;;  %v328_v8 = vld [vmem:[%s604_s26 + $0x8] sm:$0xff]  ;;  %v261_v9 = vmul.f32 %v590_v0, %v225_v7  ;;  %v226_v10 = vld [vmem:[%s598_s23 + $0x18] sm:$0xff] }
  0x10   : > { %v227_v11 = vld [vmem:[%s598_s23 + $0x20] sm:$0xff]  ;;  %v329_v14 = vld [vmem:[%s604_s26 + $0x10] sm:$0xff]  ;;  %v262_v15 = vmul.f32 %v590_v0, %v226_v10  ;;  %v330_v16 = vld [vmem:[%s604_s26 + $0x18] sm:$0xff] }
  0x11   : > { %v295_v12 = vadd.f32 %v609_v1, %v259_v4  ;;  %v296_v13 = vadd.f32 %v609_v1, %v260_v6  ;;  %v263_v17 = vmul.f32 %v590_v0, %v227_v11  ;;  %v228_v18 = vld [vmem:[%s598_s23 + $0x28] sm:$0xff]  ;;  %v297_v19 = vadd.f32 %v609_v1, %v261_v9  ;;  %v331_v20 = vld [vmem:[%s604_s26 + $0x20] sm:$0xff]  ;;  %v229_v22 = vld [vmem:[%s598_s23 + $0x30] sm:$0xff] }
  0x12   : > { %v264_v21 = vmul.f32 %v590_v0, %v228_v18  ;;  %v230_v23 = vld [vmem:[%s598_s23 + $0x38] sm:$0xff]  ;;  %v298_v26 = vadd.f32 %v609_v1, %v262_v15  ;;  %v332_v28 = vld [vmem:[%s604_s26 + $0x28] sm:$0xff]  ;;  %v265_v31 = vmul.f32 %v590_v0, %v229_v22  ;;  %v231_v33 = vld [vmem:[%s598_s23 + $0x40] sm:$0xff] }
  0x13   : > { %v359_v24 = vadd.f32 %v327_v5, %v295_v12  ;;  %v360_v25 = vadd.f32 %v328_v8, %v296_v13  ;;  %v299_v27 = vadd.f32 %v609_v1, %v263_v17  ;;  %v361_v29 = vadd.f32 %v329_v14, %v297_v19  ;;  %v232_v34 = vld [vmem:[%s598_s23 + $0x48] sm:$0xff]  ;;  %v333_v39 = vld [vmem:[%s604_s26 + $0x30] sm:$0xff]  ;;  %v334_v40 = vld [vmem:[%s604_s26 + $0x38] sm:$0xff] }
  0x14   : > { %v300_v30 = vadd.f32 %v609_v1, %v264_v21  ;;  %v266_v32 = vmul.f32 %v590_v0, %v230_v23  ;;  %v362_v37 = vadd.f32 %v330_v16, %v298_v26  ;;  %v233_v41 = vld [vmem:[%s598_s23 + $0x50] sm:$0xff]  ;;  %v301_v44 = vadd.f32 %v609_v1, %v265_v31  ;;  %v234_v46 = vld [vmem:[%s598_s23 + $0x58] sm:$0xff]  ;;  %v235_v47 = vld [vmem:[%s598_s23 + $0x60] sm:$0xff] }
  0x15   : > { %v391_v35 = vmax.f32 %v359_v24, 0.0  ;;  %v392_v36 = vmax.f32 %v360_v25, 0.0  ;;  %v363_v38 = vadd.f32 %v331_v20, %v299_v27  ;;  %v393_v42 = vmax.f32 %v361_v29, 0.0  ;;  %v236_v52 = vld [vmem:[%s598_s23 + $0x68] sm:$0xff]  ;;  %v335_v56 = vld [vmem:[%s604_s26 + $0x40] sm:$0xff]  ;;  %v337_v61 = vld [vmem:[%s604_s26 + $0x50] sm:$0xff] }
  0x16   : > { %v364_v43 = vadd.f32 %v332_v28, %v300_v30  ;;  %v302_v45 = vadd.f32 %v609_v1, %v266_v32  ;;  %v394_v48 = vmax.f32 %v362_v37, 0.0  ;;  %v267_v50 = vmul.f32 %v590_v0, %v231_v33  ;;  %v336_v57 = vld [vmem:[%s604_s26 + $0x48] sm:$0xff]  ;;  %v237_v2 = vld [vmem:[%s598_s23 + $0x70] sm:$0xff]  ;;  %v238_v3 = vld [vmem:[%s598_s23 + $0x78] sm:$0xff] }
  0x17   : > { %423 = vst [vmem:[%s640_s5] sm:$0xff] %v391_v35  ;;  %v395_v49 = vmax.f32 %v363_v38, 0.0  ;;  %v268_v51 = vmul.f32 %v590_v0, %v232_v34  ;;  %v365_v54 = vadd.f32 %v333_v39, %v301_v44  ;;  %v269_v58 = vmul.f32 %v590_v0, %v233_v41  ;;  %v338_v7 = vld [vmem:[%s604_s26 + $0x58] sm:$0xff]  ;;  %v339_v8 = vld [vmem:[%s604_s26 + $0x60] sm:$0xff]  ;;  %v340_v14 = vld [vmem:[%s604_s26 + $0x68] sm:$0xff] }
  0x18   : > { %424 = vst [vmem:[%s640_s5 + $0x8] sm:$0xff] %v392_v36  ;;  %v396_v53 = vmax.f32 %v364_v43, 0.0  ;;  %v366_v55 = vadd.f32 %v334_v40, %v302_v45  ;;  %v303_v59 = vadd.f32 %v609_v1, %v267_v50  ;;  %v270_v62 = vmul.f32 %v590_v0, %v234_v46  ;;  %v239_v19 = vld [vmem:[%s598_s23 + $0x80] sm:$0xff]  ;;  %v240_v20 = vld [vmem:[%s598_s23 + $0x88] sm:$0xff]  ;;  %v341_v25 = vld [vmem:[%s604_s26 + $0x70] sm:$0xff] }
  0x19   : > { %425 = vst [vmem:[%s640_s5 + $0x10] sm:$0xff] %v393_v42  ;;  %v304_v60 = vadd.f32 %v609_v1, %v268_v51  ;;  %v271_v63 = vmul.f32 %v590_v0, %v235_v47  ;;  %v397_v4 = vmax.f32 %v365_v54, 0.0  ;;  %v305_v6 = vadd.f32 %v609_v1, %v269_v58  ;;  %v342_v26 = vld [vmem:[%s604_s26 + $0x78] sm:$0xff]  ;;  %v241_v27 = vld [vmem:[%s598_s23 + $0x90] sm:$0xff]  ;;  %v243_v33 = vld [vmem:[%s598_s23 + $0xa0] sm:$0xff] }
  0x1a   : > { %426 = vst [vmem:[%s640_s5 + $0x18] sm:$0xff] %v394_v48  ;;  %v398_v5 = vmax.f32 %v366_v55, 0.0  ;;  %v272_v9 = vmul.f32 %v590_v0, %v236_v52  ;;  %v367_v10 = vadd.f32 %v335_v56, %v303_v59  ;;  %v306_v12 = vadd.f32 %v609_v1, %v270_v62  ;;  %v242_v32 = vld [vmem:[%s598_s23 + $0x98] sm:$0xff]  ;;  %v244_v38 = vld [vmem:[%s598_s23 + $0xa8] sm:$0xff]  ;;  %v343_v42 = vld [vmem:[%s604_s26 + $0x80] sm:$0xff] }
  0x1b   : > { %427 = vst [vmem:[%s640_s5 + $0x20] sm:$0xff] %v395_v49  ;;  %v368_v11 = vadd.f32 %v336_v57, %v304_v60  ;;  %v307_v13 = vadd.f32 %v609_v1, %v271_v63  ;;  %v369_v15 = vadd.f32 %v337_v61, %v305_v6  ;;  %v273_v17 = vmul.f32 %v590_v0, %v237_v2  ;;  %v344_v43 = vld [vmem:[%s604_s26 + $0x88] sm:$0xff]  ;;  %v345_v47 = vld [vmem:[%s604_s26 + $0x90] sm:$0xff]  ;;  %v246_v51 = vld [vmem:[%s598_s23 + $0xb8] sm:$0xff] }
  0x1c   : > { %428 = vst [vmem:[%s640_s5 + $0x28] sm:$0xff] %v396_v53  ;;  %v308_v16 = vadd.f32 %v609_v1, %v272_v9  ;;  %v274_v18 = vmul.f32 %v590_v0, %v238_v3  ;;  %v399_v21 = vmax.f32 %v367_v10, 0.0  ;;  %v370_v23 = vadd.f32 %v338_v7, %v306_v12  ;;  %v245_v50 = vld [vmem:[%s598_s23 + $0xb0] sm:$0xff]  ;;  %v346_v55 = vld [vmem:[%s604_s26 + $0x98] sm:$0xff]  ;;  %v347_v56 = vld [vmem:[%s604_s26 + $0xa0] sm:$0xff] }
  0x1d   : > { %429 = vst [vmem:[%s640_s5 + $0x30] sm:$0xff] %v397_v4  ;;  %v400_v22 = vmax.f32 %v368_v11, 0.0  ;;  %v371_v24 = vadd.f32 %v339_v8, %v307_v13  ;;  %v401_v28 = vmax.f32 %v369_v15, 0.0  ;;  %v309_v30 = vadd.f32 %v609_v1, %v273_v17  ;;  %v348_v62 = vld [vmem:[%s604_s26 + $0xa8] sm:$0xff]  ;;  %v349_v11 = vld [vmem:[%s604_s26 + $0xb0] sm:$0xff]  ;;  %v350_v12 = vld [vmem:[%s604_s26 + $0xb8] sm:$0xff] }
  0x1e   : > { %430 = vst [vmem:[%s640_s5 + $0x38] sm:$0xff] %v398_v5  ;;  %v372_v29 = vadd.f32 %v340_v14, %v308_v16  ;;  %v310_v31 = vadd.f32 %v609_v1, %v274_v18  ;;  %v402_v34 = vmax.f32 %v370_v23, 0.0  ;;  %v275_v36 = vmul.f32 %v590_v0, %v239_v19  ;;  %v247_v5 = vld [vmem:[%s598_s23 + $0xc0] sm:$0xff]  ;;  %v248_v6 = vld [vmem:[%s598_s23 + $0xc8] sm:$0xff]  ;;  %v249_v13 = vld [vmem:[%s598_s23 + $0xd0] sm:$0xff] }
  0x1f   : > { %431 = vst [vmem:[%s640_s5 + $0x40] sm:$0xff] %v399_v21  ;;  %v403_v35 = vmax.f32 %v371_v24, 0.0  ;;  %v276_v37 = vmul.f32 %v590_v0, %v240_v20  ;;  %v373_v40 = vadd.f32 %v341_v25, %v309_v30  ;;  %v277_v44 = vmul.f32 %v590_v0, %v241_v27  ;;  %v250_v18 = vld [vmem:[%s598_s23 + $0xd8] sm:$0xff]  ;;  %v251_v19 = vld [vmem:[%s598_s23 + $0xe0] sm:$0xff]  ;;  %v252_v24 = vld [vmem:[%s598_s23 + $0xe8] sm:$0xff] }
  0x20   : > { %432 = vst [vmem:[%s640_s5 + $0x48] sm:$0xff] %v400_v22  ;;  %v404_v39 = vmax.f32 %v372_v29, 0.0  ;;  %v374_v41 = vadd.f32 %v342_v26, %v310_v31  ;;  %v311_v45 = vadd.f32 %v609_v1, %v275_v36  ;;  %v278_v48 = vmul.f32 %v590_v0, %v242_v32  ;;  %v352_v29 = vld [vmem:[%s604_s26 + $0xc8] sm:$0xff]  ;;  %v253_v36 = vld [vmem:[%s598_s23 + $0xf0] sm:$0xff] }
  0x21   : > { %433 = vst [vmem:[%s640_s5 + $0x50] sm:$0xff] %v401_v28  ;;  %v312_v46 = vadd.f32 %v609_v1, %v276_v37  ;;  %v279_v49 = vmul.f32 %v590_v0, %v243_v33  ;;  %v405_v52 = vmax.f32 %v373_v40, 0.0  ;;  %v313_v54 = vadd.f32 %v609_v1, %v277_v44  ;;  %v351_v28 = vld [vmem:[%s604_s26 + $0xc0] sm:$0xff]  ;;  %v353_v33 = vld [vmem:[%s604_s26 + $0xd0] sm:$0xff]  ;;  %v254_v37 = vld [vmem:[%s598_s23 + $0xf8] sm:$0xff] }
  0x22   : > { %434 = vst [vmem:[%s640_s5 + $0x58] sm:$0xff] %v402_v34  ;;  %v406_v53 = vmax.f32 %v374_v41, 0.0  ;;  %v280_v57 = vmul.f32 %v590_v0, %v244_v38  ;;  %v375_v58 = vadd.f32 %v343_v42, %v311_v45  ;;  %v314_v60 = vadd.f32 %v609_v1, %v278_v48  ;;  %v354_v41 = vld [vmem:[%s604_s26 + $0xd8] sm:$0xff]  ;;  %v355_v42 = vld [vmem:[%s604_s26 + $0xe0] sm:$0xff]  ;;  %v356_v48 = vld [vmem:[%s604_s26 + $0xe8] sm:$0xff] }
  0x23   : > { %435 = vst [vmem:[%s640_s5 + $0x60] sm:$0xff] %v403_v35  ;;  %v376_v59 = vadd.f32 %v344_v43, %v312_v46  ;;  %v315_v61 = vadd.f32 %v609_v1, %v279_v49  ;;  %v377_v63 = vadd.f32 %v345_v47, %v313_v54  ;;  %v281_v3 = vmul.f32 %v590_v0, %v245_v50 }
  0x24   : > { %436 = vst [vmem:[%s640_s5 + $0x68] sm:$0xff] %v404_v39  ;;  %v316_v2 = vadd.f32 %v609_v1, %v280_v57  ;;  %v282_v4 = vmul.f32 %v590_v0, %v246_v51  ;;  %v407_v7 = vmax.f32 %v375_v58, 0.0  ;;  %v378_v9 = vadd.f32 %v346_v55, %v314_v60  ;;  %v357_v57 = vld [vmem:[%s604_s26 + $0xf0] sm:$0xff]  ;;  %v358_v58 = vld [vmem:[%s604_s26 + $0xf8] sm:$0xff] }
  0x25   : > { %437 = vst [vmem:[%s640_s5 + $0x70] sm:$0xff] %v405_v52  ;;  %v408_v8 = vmax.f32 %v376_v59, 0.0  ;;  %v379_v10 = vadd.f32 %v347_v56, %v315_v61  ;;  %v409_v14 = vmax.f32 %v377_v63, 0.0  ;;  %v317_v16 = vadd.f32 %v609_v1, %v281_v3 }
  0x26   : > { %438 = vst [vmem:[%s640_s5 + $0x78] sm:$0xff] %v406_v53  ;;  %v380_v15 = vadd.f32 %v348_v62, %v316_v2  ;;  %v318_v17 = vadd.f32 %v609_v1, %v282_v4  ;;  %v410_v20 = vmax.f32 %v378_v9, 0.0  ;;  %v283_v22 = vmul.f32 %v590_v0, %v247_v5 }
  0x27   : > { %439 = vst [vmem:[%s640_s5 + $0x80] sm:$0xff] %v407_v7  ;;  %v411_v21 = vmax.f32 %v379_v10, 0.0  ;;  %v284_v23 = vmul.f32 %v590_v0, %v248_v6  ;;  %v381_v26 = vadd.f32 %v349_v11, %v317_v16  ;;  %v285_v30 = vmul.f32 %v590_v0, %v249_v13 }
  0x28   : > { %440 = vst [vmem:[%s640_s5 + $0x88] sm:$0xff] %v408_v8  ;;  %v412_v25 = vmax.f32 %v380_v15, 0.0  ;;  %v382_v27 = vadd.f32 %v350_v12, %v318_v17  ;;  %v319_v31 = vadd.f32 %v609_v1, %v283_v22  ;;  %v286_v34 = vmul.f32 %v590_v0, %v250_v18 }
  0x29   : > { %441 = vst [vmem:[%s640_s5 + $0x90] sm:$0xff] %v409_v14  ;;  %v320_v32 = vadd.f32 %v609_v1, %v284_v23  ;;  %v287_v35 = vmul.f32 %v590_v0, %v251_v19  ;;  %v413_v38 = vmax.f32 %v381_v26, 0.0  ;;  %v321_v40 = vadd.f32 %v609_v1, %v285_v30 }
  0x2a   : > { %442 = vst [vmem:[%s640_s5 + $0x98] sm:$0xff] %v410_v20  ;;  %v414_v39 = vmax.f32 %v382_v27, 0.0  ;;  %v288_v43 = vmul.f32 %v590_v0, %v252_v24  ;;  %v383_v44 = vadd.f32 %v351_v28, %v319_v31  ;;  %v322_v46 = vadd.f32 %v609_v1, %v286_v34 }
  0x2b   : > { %443 = vst [vmem:[%s640_s5 + $0xa0] sm:$0xff] %v411_v21  ;;  %v384_v45 = vadd.f32 %v352_v29, %v320_v32  ;;  %v323_v47 = vadd.f32 %v609_v1, %v287_v35  ;;  %v385_v49 = vadd.f32 %v353_v33, %v321_v40  ;;  %v289_v51 = vmul.f32 %v590_v0, %v253_v36 }
  0x2c   : > { %444 = vst [vmem:[%s640_s5 + $0xa8] sm:$0xff] %v412_v25  ;;  %v324_v50 = vadd.f32 %v609_v1, %v288_v43  ;;  %v290_v52 = vmul.f32 %v590_v0, %v254_v37  ;;  %v415_v53 = vmax.f32 %v383_v44, 0.0  ;;  %v386_v55 = vadd.f32 %v354_v41, %v322_v46 }
  0x2d   : > { %445 = vst [vmem:[%s640_s5 + $0xb0] sm:$0xff] %v413_v38  ;;  %v416_v54 = vmax.f32 %v384_v45, 0.0  ;;  %v387_v56 = vadd.f32 %v355_v42, %v323_v47  ;;  %v417_v59 = vmax.f32 %v385_v49, 0.0  ;;  %v325_v61 = vadd.f32 %v609_v1, %v289_v51 }
  0x2e   : > { %446 = vst [vmem:[%s640_s5 + $0xb8] sm:$0xff] %v414_v39  ;;  %v388_v60 = vadd.f32 %v356_v48, %v324_v50  ;;  %v326_v0 = vadd.f32 %v609_v1, %v290_v52  ;;  %v418_v62 = vmax.f32 %v386_v55, 0.0 }
  0x2f   : > { %447 = vst [vmem:[%s640_s5 + $0xc0] sm:$0xff] %v415_v53  ;;  %v419_v63 = vmax.f32 %v387_v56, 0.0  ;;  %v389_v3 = vadd.f32 %v357_v57, %v325_v61 }
  0x30   : > { %448 = vst [vmem:[%s640_s5 + $0xc8] sm:$0xff] %v416_v54  ;;  %v420_v2 = vmax.f32 %v388_v60, 0.0  ;;  %v390_v4 = vadd.f32 %v358_v58, %v326_v0 }
  0x31   : > { %449 = vst [vmem:[%s640_s5 + $0xd0] sm:$0xff] %v417_v59  ;;  %v421_v5 = vmax.f32 %v389_v3, 0.0 }
  0x32   : > { %450 = vst [vmem:[%s640_s5 + $0xd8] sm:$0xff] %v418_v62  ;;  %v422_v6 = vmax.f32 %v390_v4, 0.0 }
  0x33   : > { %451 = vst [vmem:[%s640_s5 + $0xe0] sm:$0xff] %v419_v63 }
  0x34   : > { %452 = vst [vmem:[%s640_s5 + $0xe8] sm:$0xff] %v420_v2 }
  0x35   : > { %453 = vst [vmem:[%s640_s5 + $0xf0] sm:$0xff] %v421_v5 }
  0x36   : > { %454 = vst [vmem:[%s640_s5 + $0xf8] sm:$0xff] %v422_v6 }
  0x37 PF: > { %s14_s15 = sadd.s32 1, %s552_s15  }
  0x38   : > { %p11_p4 = scmp.ge.s32.totalorder %s14_s15, 4  }
  0x3a   :  { %13 = sbr.rel (!%p11_p4) target bundleno = 1 (0x1), region = 69 }

</bundles_post_ra>
